<compile_context>
chip_gen: v7x
topology: tpu7x:2x2x1
jax: 0.10.0
libtpu: 0.0.40
codegen_flags: <defaults>
</compile_context>

<pallas_src>
import jax
import jax.numpy as jnp
import numpy as np
from jax import lax
from jax.experimental import pallas as pl
from jax.experimental.pallas import tpu as pltpu

_LANES = 128


def _round_up(n, m):
    return ((n + m - 1) // m) * m


def _round_down_mult(n, m):
    return max(m, (n // m) * m)


def _pick_row_tile(rows, row_bytes, target_bytes=4 << 20, min_grid_tiles=8):
    """Row tile sized by bytes (~target_bytes per input tile), multiple of 8."""
    tm = _round_down_mult(target_bytes // max(int(row_bytes), 1), 8)
    tm = min(tm, _round_up(rows, 8))
    tm = max(tm, 8)
    # Keep enough tiles for megacore sharding / pipeline depth when rows allow.
    while tm > 8 and pl.cdiv(rows, tm) < min_grid_tiles and rows >= min_grid_tiles * 8:
        tm = _round_down_mult(tm // 2, 8)
    return tm


def _xor_linear_kernel(x_ref, w_ref, b_ref, o_ref):
    # Plain path (D >= 128 or 128 % D != 0).
    # x_ref: (tm, D)  -- halves sliced in-kernel
    # w_ref: (D, d)   -- nn.Linear layout, VMEM-resident (constant index_map)
    # b_ref: (1, D)
    # o_ref: (tm, D)
    d = x_ref.shape[1] // 2
    x = x_ref[...].astype(jnp.float32)
    a = jax.nn.sigmoid(x[:, :d])
    b = jax.nn.sigmoid(x[:, d:])
    xor_out = 0.5 * (a + b) - a * b
    acc = lax.dot_general(
        xor_out.astype(w_ref.dtype), w_ref[...],
        dimension_numbers=(((1,), (1,)), ((), ())),   # trans-B matmul on MXU
        preferred_element_type=jnp.float32,
    )
    o_ref[...] = (acc + b_ref[...].astype(jnp.float32)).astype(o_ref.dtype)


def _xor_linear_packed_kernel(x_ref, p_ref, w_ref, b_ref, o_ref):
    # Lane-packed path (D < 128 and 128 % D == 0): G = 128//D rows per
    # 128-lane super-row.
    # p_ref: (128, 128) 0/1 permutation aligning each D-block's second half
    #        with its first half (exact selection, garbage elsewhere).
    # w_ref: (128, 128) block-diagonal packed weight; rows at second-half lane
    #        positions are zero, so garbage xor values never reach the output.
    # b_ref: (1, 128) tiled bias.
    s = jax.nn.sigmoid(x_ref[...].astype(jnp.float32))
    b = jnp.dot(s, p_ref[...], preferred_element_type=jnp.float32)
    xor_out = 0.5 * (s + b) - s * b
    acc = jnp.dot(xor_out.astype(w_ref.dtype), w_ref[...],
                  preferred_element_type=jnp.float32)
    o_ref[...] = (acc + b_ref[...].astype(jnp.float32)).astype(o_ref.dtype)


def differentiable_xor_layer(x, weight, bias, *, target_tile_bytes=4 << 20):
    """x: (..., D); weight: (D, D//2) (nn.Linear layout); bias: (D,)."""
    D = x.shape[-1]
    assert D % 2 == 0, "embed_dim must be even"
    d = D // 2
    lead = x.shape[:-1]
    M = int(np.prod(lead)) if lead else 1

    weight = jnp.asarray(weight)
    bias = jnp.asarray(bias)
    x2d = x.reshape(M, D)
    x_bytes = jnp.dtype(x.dtype).itemsize
    w_bytes = jnp.dtype(weight.dtype).itemsize

    use_packed = (D < _LANES) and (_LANES % D == 0)

    if use_packed:
        G = _LANES // D
        pad_rows = (-M) % G
        if pad_rows:                      # <= G-1 rows; negligible traffic
            x2d = jnp.pad(x2d, ((0, pad_rows), (0, 0)))
        Ms = (M + pad_rows) // G
        lane_w = G * D
        xp = x2d.reshape(Ms, lane_w)      # pure reshape: no extra HBM pass

        f32 = jnp.float32
        p_blk = jnp.zeros((D, D), f32).at[d:, :d].set(jnp.eye(d, dtype=f32))
        p_mat = jnp.kron(jnp.eye(G, dtype=f32), p_blk)                      # (128,128)
        w_blk = jnp.concatenate(
            [weight.T.astype(f32), jnp.zeros((D - d, D), f32)], axis=0)     # (D, D)
        w_pk = jnp.kron(jnp.eye(G, dtype=f32), w_blk)                       # (128,128)
        b_pk = jnp.tile(bias.astype(f32), G).reshape(1, lane_w)

        tm = _pick_row_tile(Ms, lane_w * x_bytes, target_tile_bytes)
        grid = (pl.cdiv(Ms, tm),)

        tile_bytes = tm * lane_w * x_bytes
        const_bytes = (2 * lane_w * lane_w + lane_w) * 4
        # Default pipelining double-buffers every operand (incl. the invariant
        # weight/permutation/bias) -> count 2x for all of them.
        needed = 2 * (2 * tile_bytes) + 2 * const_bytes

        kernel = _xor_linear_packed_kernel
        operands = (xp, p_mat, w_pk, b_pk)
        in_specs = [
            pl.BlockSpec((tm, lane_w), lambda i: (i, 0)),
            pl.BlockSpec((lane_w, lane_w), lambda i: (0, 0)),  # VMEM-resident
            pl.BlockSpec((lane_w, lane_w), lambda i: (0, 0)),  # VMEM-resident
            pl.BlockSpec((1, lane_w), lambda i: (0, 0)),       # VMEM-resident
        ]
        out_shape = jax.ShapeDtypeStruct((Ms, lane_w), x.dtype)
        out_spec = pl.BlockSpec((tm, lane_w), lambda i: (i, 0))
        flops = 2 * (2 * Ms * lane_w * lane_w)
        bytes_accessed = 2 * Ms * lane_w * x_bytes + const_bytes
    else:
        # TODO(synk): D >= 128 but not a multiple of 128 still emits masked
        # output stores; a generalized lcm(D,128)//D packing (or padding D at
        # the model level) would make those lane-dense as well.
        b2d = bias.reshape(1, D)
        tm = _pick_row_tile(M, D * x_bytes, target_tile_bytes)
        grid = (pl.cdiv(M, tm),)
        needed = 2 * (2 * tm * D * x_bytes) + 2 * (D * d * w_bytes + D * w_bytes)

        kernel = _xor_linear_kernel
        operands = (x2d, weight, b2d)
        in_specs = [
            pl.BlockSpec((tm, D), lambda i: (i, 0)),
            pl.BlockSpec((D, d), lambda i: (0, 0)),   # VMEM-resident, no transpose
            pl.BlockSpec((1, D), lambda i: (0, 0)),   # VMEM-resident
        ]
        out_shape = jax.ShapeDtypeStruct((M, D), x.dtype)
        out_spec = pl.BlockSpec((tm, D), lambda i: (i, 0))
        flops = 2 * M * d * D
        bytes_accessed = 2 * M * D * x_bytes + (D * d + D) * w_bytes

    # Generation-aware VMEM budget (v7x: 64 MiB/TC vs 128 MiB on v5e/v6e).
    try:
        vmem_cap = int(pltpu.get_tpu_info().vmem_capacity_bytes)
    except Exception:  # pragma: no cover - fallback if hw query unavailable
        vmem_cap = 64 << 20
    vmem_limit = int(min(max(needed + (2 << 20), 16 << 20), (vmem_cap * 3) // 4))

    cost = pl.CostEstimate(
        flops=int(flops),
        transcendentals=2 * M * D,        # ~exp + reciprocal per sigmoid element
        bytes_accessed=int(bytes_accessed),
    )

    out2d = pl.pallas_call(
        kernel,
        out_shape=out_shape,
        grid=grid,
        in_specs=in_specs,
        out_specs=out_spec,
        compiler_params=pltpu.CompilerParams(
            dimension_semantics=("parallel",),
            vmem_limit_bytes=vmem_limit,
        ),
        cost_estimate=cost,
    )(*operands)

    if use_packed:
        out2d = out2d.reshape(-1, D)[:M]  # pure reshape + (maybe) drop pad rows
    return out2d.reshape(*lead, D)


def _reference(x, weight, bias):
    D = x.shape[-1]
    d = D // 2
    x1, x2 = x[..., :d], x[..., d:]
    a = jax.nn.sigmoid(x1)
    b = jax.nn.sigmoid(x2)
    xor_out = 0.5 * (a + b - 2.0 * a * b)
    return xor_out @ weight.T + bias


def _make_params(key, embed_dim):
    kw, kb = jax.random.split(key)
    fan_in = embed_dim // 2
    bound = 1.0 / np.sqrt(fan_in)
    weight = jax.random.uniform(
        kw, (embed_dim, fan_in), jnp.float32, minval=-bound, maxval=bound)
    bias = jax.random.uniform(
        kb, (embed_dim,), jnp.float32, minval=-bound, maxval=bound)
    return weight, bias


if __name__ == "__main__":
    key = jax.random.PRNGKey(0)
    kx1, kp1, kx2, kp2 = jax.random.split(key, 4)

    # Case 1 (module's small shape): D=32 -> lane-packed path (G=4).
    embed_dim, batch, seq = 32, 2, 8
    weight, bias = _make_params(kp1, embed_dim)
    x = jax.random.normal(kx1, (batch, seq, embed_dim), jnp.float32)
    out = jax.block_until_ready(differentiable_xor_layer(x, weight, bias))
    ref = _reference(x, weight, bias)
    assert out.shape == (batch, seq, embed_dim)
    assert np.allclose(np.asarray(out), np.asarray(ref), atol=1e-5, rtol=1e-5)

    # Case 2: D=256 -> plain (already lane-dense) path.
    embed_dim2, batch2, seq2 = 256, 2, 4
    weight2, bias2 = _make_params(kp2, embed_dim2)
    x2 = jax.random.normal(kx2, (batch2, seq2, embed_dim2), jnp.float32)
    out2 = jax.block_until_ready(differentiable_xor_layer(x2, weight2, bias2))
    ref2 = _reference(x2, weight2, bias2)
    assert out2.shape == (batch2, seq2, embed_dim2)
    assert np.allclose(np.asarray(out2), np.asarray(ref2), atol=1e-5, rtol=1e-5)

    print("KERNEL_OK")
</pallas_src>

<mosaic_0001>
module attributes {stable_mosaic.version = 11 : i64} {
  func.func @_xor_linear_packed_kernel(%arg0: i32, %arg1: memref<8x128xf32, #tpu.memory_space<vmem>>, %arg2: memref<128x128xf32, #tpu.memory_space<vmem>>, %arg3: memref<128x128xf32, #tpu.memory_space<vmem>>, %arg4: memref<1x128xf32, #tpu.memory_space<vmem>>, %arg5: memref<8x128xf32, #tpu.memory_space<vmem>>) attributes {dimension_semantics = [#tpu.dimension_semantics<parallel>], iteration_bounds = array<i64: 1>, scalar_prefetch = 0 : i64, scratch_operands = 0 : i64, tpu.core_type = #tpu.core_type<tc>, window_params = [{transform_indices = @transform_0, window_bounds = array<i64: 8, 128>}, {pipeline_mode = #tpu.pipeline_mode<synchronous>, transform_indices = @transform_1, window_bounds = array<i64: 128, 128>}, {pipeline_mode = #tpu.pipeline_mode<synchronous>, transform_indices = @transform_2, window_bounds = array<i64: 128, 128>}, {pipeline_mode = #tpu.pipeline_mode<synchronous>, transform_indices = @transform_3, window_bounds = array<i64: 1, 128>}, {transform_indices = @transform_4, window_bounds = array<i64: 8, 128>}]} {
    %c0 = arith.constant 0 : index
    %c0_0 = arith.constant 0 : index
    %0 = vector.load %arg1[%c0, %c0_0] : memref<8x128xf32, #tpu.memory_space<vmem>>, vector<8x128xf32>
    %1 = arith.negf %0 : vector<8x128xf32>
    %2 = math.exp %1 : vector<8x128xf32>
    %cst = arith.constant 1.000000e+00 : f32
    %3 = vector.broadcast %cst : f32 to vector<8x128xf32>
    %4 = arith.addf %3, %2 : vector<8x128xf32>
    %5 = arith.divf %3, %4 : vector<8x128xf32>
    %c0_1 = arith.constant 0 : index
    %c0_2 = arith.constant 0 : index
    %6 = vector.load %arg2[%c0_1, %c0_2] : memref<128x128xf32, #tpu.memory_space<vmem>>, vector<128x128xf32>
    %cst_3 = arith.constant dense<0.000000e+00> : vector<8x128xf32>
    %7 = tpu.matmul %5, %6, %cst_3 {dimension_numbers = #tpu.dot_dimension_numbers<[1], [0], [0], [1], [0, 0, 1, 1], [], []>} : vector<8x128xf32>, vector<128x128xf32>, vector<8x128xf32> -> vector<8x128xf32>
    %8 = arith.addf %5, %7 : vector<8x128xf32>
    %cst_4 = arith.constant 5.000000e-01 : f32
    %9 = vector.broadcast %cst_4 : f32 to vector<8x128xf32>
    %10 = arith.mulf %9, %8 : vector<8x128xf32>
    %11 = arith.mulf %5, %7 : vector<8x128xf32>
    %12 = arith.subf %10, %11 : vector<8x128xf32>
    %c0_5 = arith.constant 0 : index
    %c0_6 = arith.constant 0 : index
    %13 = vector.load %arg3[%c0_5, %c0_6] : memref<128x128xf32, #tpu.memory_space<vmem>>, vector<128x128xf32>
    %cst_7 = arith.constant dense<0.000000e+00> : vector<8x128xf32>
    %14 = tpu.matmul %12, %13, %cst_7 {dimension_numbers = #tpu.dot_dimension_numbers<[1], [0], [0], [1], [0, 0, 1, 1], [], []>} : vector<8x128xf32>, vector<128x128xf32>, vector<8x128xf32> -> vector<8x128xf32>
    %c0_8 = arith.constant 0 : index
    %c0_9 = arith.constant 0 : index
    %15 = vector.load %arg4[%c0_8, %c0_9] : memref<1x128xf32, #tpu.memory_space<vmem>>, vector<1x128xf32>
    %16 = vector.broadcast %15 : vector<1x128xf32> to vector<8x128xf32>
    %17 = arith.addf %14, %16 : vector<8x128xf32>
    %c0_10 = arith.constant 0 : index
    %c0_11 = arith.constant 0 : index
    %18 = vector.load %arg5[%c0_10, %c0_11] : memref<8x128xf32, #tpu.memory_space<vmem>>, vector<8x128xf32>
    tpu.vector_store %arg5[%c0_10, %c0_11], %17 {strides = array<i32>} : memref<8x128xf32, #tpu.memory_space<vmem>>, vector<8x128xf32>,
    return
  }
  func.func @transform_0(%arg0: i32) -> (i32, i32) {
    %c0_i32 = arith.constant 0 : i32
    %c0_i32_0 = arith.constant 0 : i32
    return %arg0, %c0_i32 : i32, i32
  }
  func.func @transform_1(%arg0: i32) -> (i32, i32) {
    %c0_i32 = arith.constant 0 : i32
    %c0_i32_0 = arith.constant 0 : i32
    %c0_i32_1 = arith.constant 0 : i32
    return %c0_i32, %c0_i32_0 : i32, i32
  }
  func.func @transform_2(%arg0: i32) -> (i32, i32) {
    %c0_i32 = arith.constant 0 : i32
    %c0_i32_0 = arith.constant 0 : i32
    %c0_i32_1 = arith.constant 0 : i32
    return %c0_i32, %c0_i32_0 : i32, i32
  }
  func.func @transform_3(%arg0: i32) -> (i32, i32) {
    %c0_i32 = arith.constant 0 : i32
    %c0_i32_0 = arith.constant 0 : i32
    %c0_i32_1 = arith.constant 0 : i32
    return %c0_i32, %c0_i32_0 : i32, i32
  }
  func.func @transform_4(%arg0: i32) -> (i32, i32) {
    %c0_i32 = arith.constant 0 : i32
    %c0_i32_0 = arith.constant 0 : i32
    return %arg0, %c0_i32 : i32, i32
  }
}

</mosaic_0001>

<bundles_post_ra>
// kernel: tpu_custom_call.1
= control target key start
LH: loop header
LB: loop body
LE: loop exit
PB: predicated region body
PF: predicated region fallthrough
CT: control target
= control target key end

     0   :  { %9 = vsyncpa [#allocation3], 0  ;;  %s646_s0 = inlined_call_operand.hbm [shape: f32[4,128], index: 0, kind: input, shape index: {}]   ;;  %s647_s1 = inlined_call_operand.hbm [shape: f32[128,128], index: 1, kind: input, shape index: {}]   ;;  %s648_s2 = inlined_call_operand.hbm [shape: f32[128,128], index: 2, kind: input, shape index: {}]   ;;  %s649_s3 = inlined_call_operand.vmem [shape: f32[1,128], index: 3, kind: input, shape index: {}]   ;;  %s650_s4 = inlined_call_operand.hbm [shape: f32[4,128], index: 4, kind: output, shape index: {}]  }
   0x1   :  { %10 = vsyncpa [#allocation6], 0 }
   0x2   :  { %11 = vsyncpa [#allocation4], 0 }
   0x3   :  { %16 = vsyncadd [#allocation3], 64  ;;  %s531_s15 = smov [#allocation5]   ;;  %s437_s19 = scalar_lea.hbm %s647_s1, 2048 }
   0x4   :  { %s29_s16 = sshll.u32 %s531_s15, 4  ;;  %p438_p0 = scmp.ne.s32.totalorder %s647_s1, %s437_s19  ;;  %s30_s16 = int_to_ptr.vmem [resolvable:$true] %s29_s16 }
   0x5   :  { %p441_p1 = scmp.lt.u32.totalorder %s437_s19, %s647_s1 }
   0x7   :  { %p443_p2 = pnand %p441_p1, %p438_p0 }
   0x9   :  { %446 = shalt.err (!%p443_p2)
}
   0xa   :  { %s447_s24 = scalar_lea.vmem %s30_s16, 2048  ;;  %p452_p4 = scmp.lt.s32.totalorder %s30_s16, %s30_s16 }
   0xb   :  { %p448_p3 = scmp.ne.s32.totalorder %s30_s16, %s447_s24  ;;  %p453_p5 = scmp.lt.s32.totalorder %s447_s24, %s447_s24 }
   0xd   :  { %p454_p6 = por %p453_p5, %p452_p4 }
   0xf   :  { %p455_p7 = pnand %p454_p6, %p448_p3 }
  0x11   :  { %458 = shalt.err (!%p455_p7)
}
  0x12   :  { %s532_s25 = smov 128   ;;  %s533_s26 = smov 8  }
  0x13   :  { %35 = dma.hbm_to_vmem [thread:$0]  %s647_s1, 2048, %s30_s16, [#allocation6], %s532_s25, %s532_s25, %s533_s26  }
  0x14   :  { %s534_s29 = smov [#allocation2]   ;;  %s459_s7 = scalar_lea.hbm %s646_s0, 64 }
  0x15   :  { %s17_s30 = sshll.u32 %s534_s29, 4  ;;  %p460_p8 = scmp.ne.s32.totalorder %s646_s0, %s459_s7  ;;  %s18_s30 = int_to_ptr.vmem [resolvable:$true] %s17_s30 }
  0x16   :  { %p463_p9 = scmp.lt.u32.totalorder %s459_s7, %s646_s0 }
  0x18   :  { %p465_p10 = pnand %p463_p9, %p460_p8 }
  0x1a   :  { %468 = shalt.err (!%p465_p10)
}
  0x1b   :  { %s469_s12 = scalar_lea.vmem %s18_s30, 64  ;;  %s473_s1 = scalar_lea.vmem %s18_s30, 128 }
  0x1c   :  { %p470_p11 = scmp.ne.s32.totalorder %s18_s30, %s469_s12  ;;  %p474_p12 = scmp.lt.s32.totalorder %s18_s30, %s18_s30 }
  0x1d   :  { %p475_p13 = scmp.lt.s32.totalorder %s473_s1, %s469_s12 }
  0x1f   :  { %p476_p0 = por %p475_p13, %p474_p12 }
  0x21   :  { %p477_p1 = pnand %p476_p0, %p470_p11 }
  0x23   :  { %480 = shalt.err (!%p477_p1)
}
  0x24   :  { %s535_s13 = smov 64   ;;  %s536_s14 = smov 4  }
  0x25   :  { %23 = dma.hbm_to_vmem [thread:$0]  %s646_s0, 64, %s18_s30, [#allocation3], %s535_s13, %s535_s13, %s536_s14  }
  0x26   :  { %s537_s17 = smov [#allocation7]   ;;  %s481_s21 = scalar_lea.hbm %s648_s2, 2048 }
  0x27   :  { %s41_s18 = sshll.u32 %s537_s17, 4  ;;  %p482_p2 = scmp.ne.s32.totalorder %s648_s2, %s481_s21  ;;  %s42_s18 = int_to_ptr.vmem [resolvable:$true] %s41_s18 }
  0x28   :  { %p485_p3 = scmp.lt.u32.totalorder %s481_s21, %s648_s2 }
  0x2a   :  { %p487_p4 = pnand %p485_p3, %p482_p2 }
  0x2c   :  { %490 = shalt.err (!%p487_p4)
}
  0x2d   :  { %s491_s28 = scalar_lea.vmem %s42_s18, 2048  ;;  %p496_p6 = scmp.lt.s32.totalorder %s42_s18, %s42_s18 }
  0x2e   :  { %p492_p5 = scmp.ne.s32.totalorder %s42_s18, %s491_s28  ;;  %p497_p7 = scmp.lt.s32.totalorder %s491_s28, %s491_s28 }
  0x30   :  { %p498_p8 = por %p497_p7, %p496_p6 }
  0x32   :  { %p499_p9 = pnand %p498_p8, %p492_p5 }
  0x34   :  { %502 = shalt.err (!%p499_p9)
}
  0x35   :  { %47 = dma.hbm_to_vmem [thread:$0]  %s648_s2, 2048, %s42_s18, [#allocation6], %s532_s25, %s532_s25, %s533_s26  }
  0x36   :  { %525 = dma.done.wait [#allocation3], 128  }
  0x37   :  { %526 = vsyncadd [#allocation3], 4294967168 }
  0x38   :  { %527 = dma.done.wait [#allocation6], 4096  }
  0x39   :  { %528 = vsyncadd [#allocation6], 4294963200  ;;  %v538_v0 = vmov 0.0|0.0   ;;  %vm539_vm0 = vmmov 0   ;;  %v540_v1 = vmov 0.0   ;;  %v66_v2 = vld [vmem:[#allocation5] sm:$0xff] }
  0x3a   :  { %374 = vmatprep.subr.bf16.mxu0 %v538_v0  ;;  %336 = vmatprep.mubr.msk.f32.mxu0 %vm539_vm0, %v540_v1  ;;  %v67_v3 = vld [vmem:[#allocation5 + $0x8] sm:$0xff]  ;;  %v68_v4 = vld [vmem:[#allocation5 + $0x10] sm:$0xff]  ;;  %v69_v6 = vld [vmem:[#allocation5 + $0x18] sm:$0xff] }
  0x3b   :  { %398 = vmatprep.subr.bf16.mxu1 %v538_v0  ;;  %371 = vmatprep.mubr.msk.f32.mxu1 %vm539_vm0, %v540_v1  ;;  %v375_v5 = vpack.c.bf16 %v67_v3, %v66_v2  ;;  %v378_v7 = vpack.c.bf16 %v69_v6, %v68_v4  ;;  %v70_v8 = vld [vmem:[#allocation5 + $0x20] sm:$0xff]  ;;  %v71_v9 = vld [vmem:[#allocation5 + $0x28] sm:$0xff]  ;;  %v59_v10 = vld [vmem:[#allocation2] sm:$0xff] }
  0x3c   :  { %v156_v11 = vld [vmem:[#allocation7] sm:$0xff]  ;;  %v268_v12 = vmul.f32 -1.442695, %v59_v10  ;;  %v157_v13 = vld [vmem:[#allocation7 + $0x8] sm:$0xff]  ;;  %v158_v14 = vld [vmem:[#allocation7 + $0x10] sm:$0xff]  ;;  %v381_v16 = vpack.c.bf16 %v71_v9, %v70_v8 }
  0x3d   :  { %376 = vmatpush3.bf16.msra.mxu0 %v375_v5  ;;  %v159_v15 = vld [vmem:[#allocation7 + $0x18] sm:$0xff]  ;;  %v399_v17 = vpack.c.bf16 %v157_v13, %v156_v11  ;;  %v72_v18 = vld [vmem:[#allocation5 + $0x30] sm:$0xff]  ;;  %v160_v21 = vld [vmem:[#allocation7 + $0x20] sm:$0xff] }
  0x3e   :  { %377 = vmatprep.subr.bf16.mxu0 %v538_v0  ;;  %v73_v19 = vld [vmem:[#allocation5 + $0x38] sm:$0xff]  ;;  %433 = vpow2.f32 %v268_v12  ;;  %v402_v20 = vpack.c.bf16 %v159_v15, %v158_v14  ;;  %v161_v22 = vld [vmem:[#allocation7 + $0x28] sm:$0xff]  ;;  %v74_v24 = vld [vmem:[#allocation5 + $0x40] sm:$0xff] }
  0x3f   :  { %400 = vmatpush3.bf16.msra.mxu1 %v399_v17  ;;  %v384_v23 = vpack.c.bf16 %v73_v19, %v72_v18  ;;  %v75_v25 = vld [vmem:[#allocation5 + $0x48] sm:$0xff]  ;;  %v405_v26 = vpack.c.bf16 %v161_v22, %v160_v21  ;;  %v162_v27 = vld [vmem:[#allocation7 + $0x30] sm:$0xff]  ;;  %v163_v28 = vld [vmem:[#allocation7 + $0x38] sm:$0xff] }
  0x40   :  { %401 = vmatprep.subr.bf16.mxu1 %v538_v0  ;;  %v387_v29 = vpack.c.bf16 %v75_v25, %v74_v24  ;;  %v76_v30 = vld [vmem:[#allocation5 + $0x50] sm:$0xff]  ;;  %v77_v31 = vld [vmem:[#allocation5 + $0x58] sm:$0xff]  ;;  %v408_v32 = vpack.c.bf16 %v163_v28, %v162_v27  ;;  %v164_v34 = vld [vmem:[#allocation7 + $0x40] sm:$0xff] }
  0x41   :  { %379 = vmatpush3.bf16.msra.mxu0 %v378_v7  ;;  %v165_v35 = vld [vmem:[#allocation7 + $0x48] sm:$0xff]  ;;  %v390_v36 = vpack.c.bf16 %v77_v31, %v76_v30  ;;  %v78_v38 = vld [vmem:[#allocation5 + $0x60] sm:$0xff]  ;;  %v166_v41 = vld [vmem:[#allocation7 + $0x50] sm:$0xff] }
  0x42   :  { %380 = vmatprep.subr.bf16.mxu0 %v538_v0  ;;  %v79_v39 = vld [vmem:[#allocation5 + $0x68] sm:$0xff]  ;;  %v411_v40 = vpack.c.bf16 %v165_v35, %v164_v34  ;;  %v167_v42 = vld [vmem:[#allocation7 + $0x58] sm:$0xff]  ;;  %v80_v44 = vld [vmem:[#allocation5 + $0x70] sm:$0xff] }
  0x43   :  { %403 = vmatpush3.bf16.msra.mxu1 %v402_v20  ;;  %v393_v43 = vpack.c.bf16 %v79_v39, %v78_v38  ;;  %v81_v45 = vld [vmem:[#allocation5 + $0x78] sm:$0xff]  ;;  %v414_v46 = vpack.c.bf16 %v167_v42, %v166_v41  ;;  %v168_v49 = vld [vmem:[#allocation7 + $0x60] sm:$0xff]  ;;  %v169_v50 = vld [vmem:[#allocation7 + $0x68] sm:$0xff] }
  0x44   :  { %404 = vmatprep.subr.bf16.mxu1 %v538_v0  ;;  %v396_v47 = vpack.c.bf16 %v81_v45, %v80_v44  ;;  %v417_v51 = vpack.c.bf16 %v169_v50, %v168_v49  ;;  %v170_v52 = vld [vmem:[#allocation7 + $0x70] sm:$0xff]  ;;  %v171_v53 = vld [vmem:[#allocation7 + $0x78] sm:$0xff] }
  0x45   :  { %382 = vmatpush3.bf16.msra.mxu0 %v381_v16  ;;  %v420_v54 = vpack.c.bf16 %v171_v53, %v170_v52  ;;  %v269_v61 = vld [vmem:[%s649_s3] ss:$0 sm:$0xff] }
  0x46   :  { %383 = vmatprep.subr.bf16.mxu0 %v538_v0 }
  0x47   :  { %406 = vmatpush3.bf16.msra.mxu1 %v405_v26 }
  0x48   :  { %v434_v33 = vpop.eup %433  ;;  %407 = vmatprep.subr.bf16.mxu1 %v538_v0 }
  0x49   :  { %385 = vmatpush3.bf16.msra.mxu0 %v384_v23  ;;  %v63_v37 = vadd.f32 1.0, %v434_v33 }
  0x4a   :  { %386 = vmatprep.subr.bf16.mxu0 %v538_v0 }
  0x4b   :  { %435 = vrcp.f32 %v63_v37  ;;  %409 = vmatpush3.bf16.msra.mxu1 %v408_v32 }
  0x4c   :  { %410 = vmatprep.subr.bf16.mxu1 %v538_v0 }
  0x4d   :  { %388 = vmatpush3.bf16.msra.mxu0 %v387_v29 }
  0x4e   :  { %389 = vmatprep.subr.bf16.mxu0 %v538_v0 }
  0x4f   :  { %412 = vmatpush3.bf16.msra.mxu1 %v411_v40 }
  0x50   :  { %413 = vmatprep.subr.bf16.mxu1 %v538_v0 }
  0x51   :  { %391 = vmatpush3.bf16.msra.mxu0 %v390_v36 }
  0x52   :  { %392 = vmatprep.subr.bf16.mxu0 %v538_v0 }
  0x53   :  { %415 = vmatpush3.bf16.msra.mxu1 %v414_v46 }
  0x54   :  { %416 = vmatprep.subr.bf16.mxu1 %v538_v0 }
  0x55   :  { %394 = vmatpush3.bf16.msra.mxu0 %v393_v43  ;;  %v436_v48 = vpop.eup %435 }
  0x56   :  { %395 = vmatprep.subr.bf16.mxu0 %v538_v0 }
  0x57   :  { %418 = vmatpush3.bf16.msra.mxu1 %v417_v51 }
  0x58   :  { %419 = vmatprep.subr.bf16.mxu1 %v538_v0 }
  0x59   :  { %397 = vmatpush3.bf16.msra.mxu0 %v396_v47 }
  0x5b   :  { %421 = vmatpush3.bf16.msra.mxu1 %v420_v54 }
  0x5c   :  { %337 = vmatmul.mubr.f32.vlgmr.msra.gmra.mrb[0].mxu0 %v436_v48 }
 0x12f   :  { %v148_v55 = vpop.f32.mrb[0].mxu0 }
 0x130   :  { %v152_v56 = vadd.f32 %v436_v48, %v148_v55  ;;  %v338_v57 = vpop.f32.mrb[1].mxu0  ;;  %v154_v59 = vmul.f32 %v436_v48, %v148_v55 }
 0x132   :  { %v153_v58 = vmul.f32 0.5, %v152_v56 }
 0x134   :  { %v155_v60 = vsub.f32 %v153_v58, %v154_v59 }
 0x136   :  { %372 = vmatmul.mubr.f32.vlgmr.msra.gmra.mrb[0].mxu1 %v155_v60 }
 0x209   :  { %v245_v62 = vpop.f32.mrb[0].mxu1 }
 0x20a   :  { %v246_v63 = vadd.f32 %v269_v61, %v245_v62  ;;  %v373_v1 = vpop.f32.mrb[1].mxu1 }
 0x20c   :  { %249 = vst [vmem:[#allocation8] sm:$0xff] %v246_v63 }
 0x20d   :  { %254 = vsyncadd [#allocation4], 64  ;;  %s541_s26 = smov [#allocation8]  }
 0x20e   :  { %s255_s30 = sshll.u32 %s541_s26, 4  ;;  %s256_s30 = int_to_ptr.vmem [resolvable:$true] %s255_s30 }
 0x20f   :  { %s503_s5 = scalar_lea.vmem %s256_s30, 64  ;;  %s507_s6 = scalar_lea.vmem %s256_s30, 128 }
 0x210   :  { %p504_p10 = scmp.ne.s32.totalorder %s256_s30, %s503_s5  ;;  %p508_p11 = scmp.lt.s32.totalorder %s256_s30, %s256_s30 }
 0x211   :  { %p509_p12 = scmp.lt.s32.totalorder %s507_s6, %s503_s5 }
 0x213   :  { %p510_p13 = por %p509_p12, %p508_p11 }
 0x215   :  { %p511_p0 = pnand %p510_p13, %p504_p10 }
 0x217   :  { %514 = shalt.err (!%p511_p0)
}
 0x218   :  { %s515_s3 = scalar_lea.hbm %s650_s4, 64 }
 0x219   :  { %p516_p1 = scmp.ne.s32.totalorder %s650_s4, %s515_s3  ;;  %p519_p2 = scmp.lt.u32.totalorder %s515_s3, %s650_s4 }
 0x21b   :  { %p521_p3 = pnand %p519_p2, %p516_p1 }
 0x21d   :  { %524 = shalt.err (!%p521_p3)
}
 0x21e   :  { %261 = dma.vmem_to_hbm [thread:$0]  %s256_s30, 64, %s650_s4, [#allocation4], %s535_s13, %s535_s13, %s536_s14  }
 0x21f   :  { %529 = dma.done.wait [#allocation4], 128  }
 0x220   :  { %530 = vsyncadd [#allocation4], 4294967168 }
 0x221   :  { %265 = vsyncpa [#allocation3], 1 }
 0x222   :  { %266 = vsyncpa [#allocation6], 1 }
 0x223   :  { %267 = vsyncpa [#allocation4], 1 }

</bundles_post_ra>
